<compile_context>
chip_gen: v7x
topology: tpu7x:2x2x1
jax: 0.10.0
libtpu: 0.0.40
codegen_flags: <defaults>
</compile_context>

<pallas_src>
import numpy as np
import jax
import jax.numpy as jnp
from jax.experimental import pallas as pl
from jax.experimental.pallas import tpu as pltpu


def _make_semivae_kernel(hidden, latent_dim, bias_widths):
    """Kernel body, closed over the static layer structure.

    Weight order: enc_0..enc_{n-1}, fused head (mu||log_var, lane-padded to
    128), latent_layer, dec_0..dec_{n-1}.  bias_widths[i] = output width of
    layer i inside the packed bias buffer.
    """
    n = len(hidden)
    n_w = 2 * n + 2  # number of weight matrices

    def kernel(*refs):
        x_ref, eps_ref = refs[0], refs[1]
        w_refs = refs[2:2 + n_w]
        b_ref = refs[2 + n_w]
        xhat_ref, mulv_ref = refs[3 + n_w], refs[4 + n_w]

        f32, bf16 = jnp.float32, jnp.bfloat16

        def linear(act, i):
            # bf16 MXU inputs, f32 accumulate, f32 bias add
            w = w_refs[i][...]
            b = b_ref[i:i + 1, :bias_widths[i]]
            return jnp.dot(act.astype(bf16), w, preferred_element_type=f32) + b

        # ------------- encoder: x = relu(fc(x)) per layer -------------------
        h = x_ref[...]
        for j in range(n):
            h = jnp.maximum(linear(h, j), 0.0)

        # --- fused lane-padded head: cols [0:L)=mu, [L:2L)=log_var_pre, 0s --
        ml = linear(h, n)                                   # (T, 128) f32
        lane = jax.lax.broadcasted_iota(jnp.int32, ml.shape, 1)
        is_lv = jnp.logical_and(lane >= latent_dim, lane < 2 * latent_dim)
        mulv = jnp.where(is_lv, jax.nn.softplus(ml), ml)    # softplus(log_var) only

        mu = mulv[:, :latent_dim]
        log_var = mulv[:, latent_dim:2 * latent_dim]

        # ------- reparameterization: z = eps * exp(0.5*log_var) + mu --------
        z = eps_ref[...] * jnp.exp(0.5 * log_var) + mu      # f32

        # ------- decoder: latent_layer, then fc(relu(x)) per layer ----------
        d = linear(z, n + 1)
        for j in range(n):
            d = linear(jnp.maximum(d, 0.0), n + 2 + j)
        x_hat = jax.nn.sigmoid(d)                           # f32

        xhat_ref[...] = x_hat.astype(xhat_ref.dtype)        # f32, lane-dense (D)
        mulv_ref[...] = mulv.astype(mulv_ref.dtype)         # f32, lane-dense (128)

    return kernel


def semi_vae_forward(x, eps, weights, b_packed, in_dim, hidden, latent_dim,
                     *, tile_n=2048):
    """x: [N, *in_dim] (any float dtype); eps: [N, latent_dim] (randn noise).

    tile_n: batch rows per grid step (multiple of 8).  Default 2048; push to
    4096-8192 on v7x.  It is clamped to the (8-aligned) batch for tiny N.
    """
    assert tile_n % 8 == 0, "tile_n must be a multiple of 8 (sublane width)"
    N = x.shape[0]
    D = int(np.prod(in_dim))
    n = len(hidden)
    head_pad = int(weights[n].shape[1])        # lane-padded fused-head width

    x_flat = x.reshape(N, D)                    # contiguous reshape: free
    eps = eps.astype(jnp.float32)

    # No wrapper-side padding: clamp the tile and let Pallas mask the ragged
    # tail tile of the batch grid.
    tile = max(8, min(tile_n, ((N + 7) // 8) * 8))
    grid = (pl.cdiv(N, tile),)

    def resident(shape):                        # same block every grid step
        return pl.BlockSpec(shape, lambda i: (0, 0))

    in_specs = (
        [pl.BlockSpec((tile, D), lambda i: (i, 0)),             # x tile
         pl.BlockSpec((tile, latent_dim), lambda i: (i, 0))]    # eps tile
        + [resident(tuple(w.shape)) for w in weights]
        + [resident(tuple(b_packed.shape))]
    )
    out_specs = (
        pl.BlockSpec((tile, D), lambda i: (i, 0)),              # x_hat (f32)
        pl.BlockSpec((tile, head_pad), lambda i: (i, 0)),       # mu||log_var||0
    )

    bias_widths = tuple(int(w.shape[1]) for w in weights)
    kernel = _make_semivae_kernel(hidden, latent_dim, bias_widths)

    x_hat_flat, mu_lv = pl.pallas_call(
        kernel,
        grid=grid,
        in_specs=in_specs,
        out_specs=out_specs,
        out_shape=(
            jax.ShapeDtypeStruct((N, D), jnp.float32),          # no post-upcast
            jax.ShapeDtypeStruct((N, head_pad), jnp.float32),
        ),
        compiler_params=pltpu.CompilerParams(
            # Batch axis is embarrassingly parallel -> megacore sharding on v7x.
            dimension_semantics=("parallel",),
            # VMEM stays < ~13 MB even at tile_n=4096, so the scoped default
            # (32 MiB) is fine on v5e/v6e/v7x; raise vmem_limit_bytes only if
            # tile_n is pushed well beyond 8192.
        ),
    )(x_flat, eps, *weights, b_packed)

    x_hat = x_hat_flat.reshape((N,) + tuple(in_dim))
    mu = mu_lv[:, :latent_dim]
    log_var = mu_lv[:, latent_dim:2 * latent_dim]
    return x_hat, mu, log_var


def make_params(key, in_dim, latent_dim, hidden):
    """Deterministic init.  Weights [in, out] bf16 (fused head lane-padded to
    a 128-wide output); biases packed into one lane-padded f32 buffer."""
    D = int(np.prod(in_dim))
    n = len(hidden)
    head_pad = max(128, ((2 * latent_dim + 127) // 128) * 128)

    dims = [(D, hidden[0])]
    for i in range(n - 1):
        dims.append((hidden[i], hidden[i + 1]))
    dims.append((hidden[-1], 2 * latent_dim))      # fused mu || log_var head
    dims.append((latent_dim, hidden[-1]))          # latent_layer
    for i in range(n - 1):                         # decoder (reverse widths)
        dims.append((hidden[n - i - 1], hidden[n - i - 2]))
    dims.append((hidden[0], D))

    weights, biases = [], []
    for li, (fan_in, fan_out) in enumerate(dims):
        key, kw, kb = jax.random.split(key, 3)
        scale = 1.0 / np.sqrt(fan_in)
        w = np.asarray(jax.random.uniform(kw, (fan_in, fan_out), jnp.float32,
                                          -scale, scale))
        b = np.asarray(jax.random.uniform(kb, (fan_out,), jnp.float32,
                                          -scale, scale))
        if li == n:  # lane-pad the fused head so its output store is dense
            w = np.concatenate(
                [w, np.zeros((fan_in, head_pad - fan_out), np.float32)], axis=1)
            b = np.concatenate([b, np.zeros((head_pad - fan_out,), np.float32)])
        weights.append(jnp.asarray(w, jnp.bfloat16))
        biases.append(b)

    max_w = max(b.shape[0] for b in biases)
    lane_w = ((max_w + 127) // 128) * 128
    rows = ((len(biases) + 7) // 8) * 8
    b_packed = np.zeros((rows, lane_w), np.float32)
    for i, b in enumerate(biases):
        b_packed[i, :b.shape[0]] = b
    return weights, jnp.asarray(b_packed)


def semi_vae_reference(x, eps, weights, b_packed, in_dim, hidden, latent_dim):
    """Plain-JAX reference using the same bf16-input / f32-accumulate recipe."""
    N = x.shape[0]
    D = int(np.prod(in_dim))
    n = len(hidden)
    bw = [int(w.shape[1]) for w in weights]
    f32, bf16 = jnp.float32, jnp.bfloat16

    def lin(a, i):
        return (jnp.dot(a.astype(bf16), weights[i], preferred_element_type=f32)
                + b_packed[i, :bw[i]][None, :])

    h = x.reshape(N, D)
    for j in range(n):
        h = jnp.maximum(lin(h, j), 0.0)
    ml = lin(h, n)                                  # (N, 128) lane-padded head
    mu = ml[:, :latent_dim]
    log_var = jax.nn.softplus(ml[:, latent_dim:2 * latent_dim])
    z = eps * jnp.exp(0.5 * log_var) + mu
    d = lin(z, n + 1)
    for j in range(n):
        d = lin(jnp.maximum(d, 0.0), n + 2 + j)
    x_hat = jax.nn.sigmoid(d)
    return x_hat.reshape((N,) + tuple(in_dim)), mu, log_var


if __name__ == "__main__":
    # Small shapes consistent with the module: in_dim=[4,32] (4 KPI series of
    # length 32 -> D=128), hidden=[64,32], latent_dim=16.  N=40 with tile_n=16
    # exercises the batch grid (3 steps) INCLUDING the ragged tail tile (8
    # valid rows) that Pallas masks -- no wrapper-side padding.
    in_dim = [4, 32]
    hidden = [64, 32]
    latent_dim = 16
    N = 40
    tile_n = 16   # demo-sized; production default is 2048 (4096-8192 on v7x)

    key = jax.random.PRNGKey(0)
    k_x, k_eps, k_p = jax.random.split(key, 3)
    x = jax.random.uniform(k_x, (N,) + tuple(in_dim), jnp.float32)
    eps = jax.random.normal(k_eps, (N, latent_dim), jnp.float32)  # randn_like
    weights, b_packed = make_params(k_p, in_dim, latent_dim, hidden)

    x_hat, mu, log_var = semi_vae_forward(
        x, eps, weights, b_packed, in_dim, hidden, latent_dim, tile_n=tile_n)
    jax.block_until_ready((x_hat, mu, log_var))

    # Correctness check against the plain-JAX reference (bf16-MXU tolerances;
    # softplus on log_var matches the original torch SemiVAE.encoder).
    x_hat_r, mu_r, log_var_r = semi_vae_reference(
        x, eps, weights, b_packed, in_dim, hidden, latent_dim)
    assert x_hat.shape == (N,) + tuple(in_dim)
    assert mu.shape == (N, latent_dim) and log_var.shape == (N, latent_dim)
    np.testing.assert_allclose(np.asarray(x_hat), np.asarray(x_hat_r),
                               rtol=2e-2, atol=2e-2)
    np.testing.assert_allclose(np.asarray(mu), np.asarray(mu_r),
                               rtol=2e-2, atol=2e-2)
    np.testing.assert_allclose(np.asarray(log_var), np.asarray(log_var_r),
                               rtol=2e-2, atol=2e-2)
    assert np.all(np.isfinite(np.asarray(x_hat)))

    print("KERNEL_OK")
</pallas_src>

<mosaic_0001>
module attributes {stable_mosaic.version = 11 : i64} {
  func.func @kernel(%arg0: i32, %arg1: memref<16x128xf32, #tpu.memory_space<vmem>>, %arg2: memref<16x16xf32, #tpu.memory_space<vmem>>, %arg3: memref<128x64xbf16, #tpu.memory_space<vmem>>, %arg4: memref<64x32xbf16, #tpu.memory_space<vmem>>, %arg5: memref<32x128xbf16, #tpu.memory_space<vmem>>, %arg6: memref<16x32xbf16, #tpu.memory_space<vmem>>, %arg7: memref<32x64xbf16, #tpu.memory_space<vmem>>, %arg8: memref<64x128xbf16, #tpu.memory_space<vmem>>, %arg9: memref<8x128xf32, #tpu.memory_space<vmem>>, %arg10: memref<16x128xf32, #tpu.memory_space<vmem>>, %arg11: memref<16x128xf32, #tpu.memory_space<vmem>>) attributes {dimension_semantics = [#tpu.dimension_semantics<parallel>], iteration_bounds = array<i64: 3>, scalar_prefetch = 0 : i64, scratch_operands = 0 : i64, tpu.core_type = #tpu.core_type<tc>, window_params = [{transform_indices = @transform_0, window_bounds = array<i64: 16, 128>}, {transform_indices = @transform_1, window_bounds = array<i64: 16, 16>}, {pipeline_mode = #tpu.pipeline_mode<synchronous>, transform_indices = @transform_2, window_bounds = array<i64: 128, 64>}, {pipeline_mode = #tpu.pipeline_mode<synchronous>, transform_indices = @transform_3, window_bounds = array<i64: 64, 32>}, {pipeline_mode = #tpu.pipeline_mode<synchronous>, transform_indices = @transform_4, window_bounds = array<i64: 32, 128>}, {pipeline_mode = #tpu.pipeline_mode<synchronous>, transform_indices = @transform_5, window_bounds = array<i64: 16, 32>}, {pipeline_mode = #tpu.pipeline_mode<synchronous>, transform_indices = @transform_6, window_bounds = array<i64: 32, 64>}, {pipeline_mode = #tpu.pipeline_mode<synchronous>, transform_indices = @transform_7, window_bounds = array<i64: 64, 128>}, {pipeline_mode = #tpu.pipeline_mode<synchronous>, transform_indices = @transform_8, window_bounds = array<i64: 8, 128>}, {transform_indices = @transform_9, window_bounds = array<i64: 16, 128>}, {transform_indices = @transform_10, window_bounds = array<i64: 16, 128>}]} {
    %c0 = arith.constant 0 : index
    %c0_0 = arith.constant 0 : index
    %0 = vector.load %arg1[%c0, %c0_0] : memref<16x128xf32, #tpu.memory_space<vmem>>, vector<16x128xf32>
    %c0_1 = arith.constant 0 : index
    %c0_2 = arith.constant 0 : index
    %1 = vector.load %arg3[%c0_1, %c0_2] : memref<128x64xbf16, #tpu.memory_space<vmem>>, vector<128x64xbf16>
    %c0_3 = arith.constant 0 : index
    %c0_4 = arith.constant 0 : index
    %2 = vector.load %arg9[%c0_3, %c0_4] : memref<8x128xf32, #tpu.memory_space<vmem>>, vector<1x64xf32>
    %3 = arith.truncf %0 : vector<16x128xf32> to vector<16x128xbf16>
    %cst = arith.constant dense<0.000000e+00> : vector<16x64xf32>
    %4 = tpu.matmul %3, %1, %cst {dimension_numbers = #tpu.dot_dimension_numbers<[1], [0], [0], [1], [0, 0, 1, 1], [], []>} : vector<16x128xbf16>, vector<128x64xbf16>, vector<16x64xf32> -> vector<16x64xf32>
    %5 = vector.broadcast %2 : vector<1x64xf32> to vector<16x64xf32>
    %6 = arith.addf %4, %5 : vector<16x64xf32>
    %cst_5 = arith.constant 0.000000e+00 : f32
    %7 = vector.broadcast %cst_5 : f32 to vector<16x64xf32>
    %8 = arith.maximumf %6, %7 : vector<16x64xf32>
    %c0_6 = arith.constant 0 : index
    %c0_7 = arith.constant 0 : index
    %9 = vector.load %arg4[%c0_6, %c0_7] : memref<64x32xbf16, #tpu.memory_space<vmem>>, vector<64x32xbf16>
    %c1 = arith.constant 1 : index
    %c0_8 = arith.constant 0 : index
    %10 = vector.load %arg9[%c1, %c0_8] : memref<8x128xf32, #tpu.memory_space<vmem>>, vector<1x32xf32>
    %11 = arith.truncf %8 : vector<16x64xf32> to vector<16x64xbf16>
    %cst_9 = arith.constant dense<0.000000e+00> : vector<16x32xf32>
    %12 = tpu.matmul %11, %9, %cst_9 {dimension_numbers = #tpu.dot_dimension_numbers<[1], [0], [0], [1], [0, 0, 1, 1], [], []>} : vector<16x64xbf16>, vector<64x32xbf16>, vector<16x32xf32> -> vector<16x32xf32>
    %13 = vector.broadcast %10 : vector<1x32xf32> to vector<16x32xf32>
    %14 = arith.addf %12, %13 : vector<16x32xf32>
    %cst_10 = arith.constant 0.000000e+00 : f32
    %15 = vector.broadcast %cst_10 : f32 to vector<16x32xf32>
    %16 = arith.maximumf %14, %15 : vector<16x32xf32>
    %c0_11 = arith.constant 0 : index
    %c0_12 = arith.constant 0 : index
    %17 = vector.load %arg5[%c0_11, %c0_12] : memref<32x128xbf16, #tpu.memory_space<vmem>>, vector<32x128xbf16>
    %c2 = arith.constant 2 : index
    %c0_13 = arith.constant 0 : index
    %18 = vector.load %arg9[%c2, %c0_13] : memref<8x128xf32, #tpu.memory_space<vmem>>, vector<1x128xf32>
    %19 = arith.truncf %16 : vector<16x32xf32> to vector<16x32xbf16>
    %cst_14 = arith.constant dense<0.000000e+00> : vector<16x128xf32>
    %20 = tpu.matmul %19, %17, %cst_14 {dimension_numbers = #tpu.dot_dimension_numbers<[1], [0], [0], [1], [0, 0, 1, 1], [], []>} : vector<16x32xbf16>, vector<32x128xbf16>, vector<16x128xf32> -> vector<16x128xf32>
    %21 = vector.broadcast %18 : vector<1x128xf32> to vector<16x128xf32>
    %22 = arith.addf %20, %21 : vector<16x128xf32>
    %23 = tpu.iota {dimensions = array<i32: 1>} : vector<16x128xi32>
    %c16_i32 = arith.constant 16 : i32
    %24 = vector.broadcast %c16_i32 : i32 to vector<16x128xi32>
    %25 = arith.cmpi sge, %23, %24 : vector<16x128xi32>
    %c32_i32 = arith.constant 32 : i32
    %26 = vector.broadcast %c32_i32 : i32 to vector<16x128xi32>
    %27 = arith.cmpi slt, %23, %26 : vector<16x128xi32>
    %28 = arith.andi %25, %27 : vector<16x128xi1>
    %cst_15 = arith.constant 0.000000e+00 : f32
    %29 = vector.broadcast %cst_15 : f32 to vector<16x128xf32>
    %30 = arith.maximumf %22, %29 : vector<16x128xf32>
    %31 = vector.broadcast %cst_15 : f32 to vector<16x128xf32>
    %32 = arith.subf %22, %31 : vector<16x128xf32>
    %33 = arith.cmpf one, %32, %32 : vector<16x128xf32>
    %34 = vector.broadcast %cst_15 : f32 to vector<16x128xf32>
    %35 = arith.addf %22, %34 : vector<16x128xf32>
    %36 = math.absf %32 : vector<16x128xf32>
    %cst_16 = arith.constant 0.000000e+00 : f32
    %37 = vector.broadcast %cst_16 : f32 to vector<16x128xf32>
    %38 = arith.subf %37, %36 : vector<16x128xf32>
    %39 = math.exp %38 : vector<16x128xf32>
    %40 = math.log1p %39 : vector<16x128xf32>
    %41 = arith.addf %30, %40 : vector<16x128xf32>
    %42 = arith.select %33, %35, %41 : vector<16x128xi1>, vector<16x128xf32>
    %43 = arith.select %28, %42, %22 : vector<16x128xi1>, vector<16x128xf32>
    %44 = vector.extract_strided_slice %43 {offsets = [0, 0], sizes = [16, 16], strides = [1, 1]} : vector<16x128xf32> to vector<16x16xf32>
    %45 = vector.extract_strided_slice %43 {offsets = [0, 16], sizes = [16, 16], strides = [1, 1]} : vector<16x128xf32> to vector<16x16xf32>
    %c0_17 = arith.constant 0 : index
    %c0_18 = arith.constant 0 : index
    %46 = vector.load %arg2[%c0_17, %c0_18] : memref<16x16xf32, #tpu.memory_space<vmem>>, vector<16x16xf32>
    %cst_19 = arith.constant 5.000000e-01 : f32
    %47 = vector.broadcast %cst_19 : f32 to vector<16x16xf32>
    %48 = arith.mulf %47, %45 : vector<16x16xf32>
    %49 = math.exp %48 : vector<16x16xf32>
    %50 = arith.mulf %46, %49 : vector<16x16xf32>
    %51 = arith.addf %50, %44 : vector<16x16xf32>
    %c0_20 = arith.constant 0 : index
    %c0_21 = arith.constant 0 : index
    %52 = vector.load %arg6[%c0_20, %c0_21] : memref<16x32xbf16, #tpu.memory_space<vmem>>, vector<16x32xbf16>
    %c3 = arith.constant 3 : index
    %c0_22 = arith.constant 0 : index
    %53 = vector.load %arg9[%c3, %c0_22] : memref<8x128xf32, #tpu.memory_space<vmem>>, vector<1x32xf32>
    %54 = arith.truncf %51 : vector<16x16xf32> to vector<16x16xbf16>
    %cst_23 = arith.constant dense<0.000000e+00> : vector<16x32xf32>
    %55 = tpu.matmul %54, %52, %cst_23 {dimension_numbers = #tpu.dot_dimension_numbers<[1], [0], [0], [1], [0, 0, 1, 1], [], []>} : vector<16x16xbf16>, vector<16x32xbf16>, vector<16x32xf32> -> vector<16x32xf32>
    %56 = vector.broadcast %53 : vector<1x32xf32> to vector<16x32xf32>
    %57 = arith.addf %55, %56 : vector<16x32xf32>
    %cst_24 = arith.constant 0.000000e+00 : f32
    %58 = vector.broadcast %cst_24 : f32 to vector<16x32xf32>
    %59 = arith.maximumf %57, %58 : vector<16x32xf32>
    %c0_25 = arith.constant 0 : index
    %c0_26 = arith.constant 0 : index
    %60 = vector.load %arg7[%c0_25, %c0_26] : memref<32x64xbf16, #tpu.memory_space<vmem>>, vector<32x64xbf16>
    %c4 = arith.constant 4 : index
    %c0_27 = arith.constant 0 : index
    %61 = vector.load %arg9[%c4, %c0_27] : memref<8x128xf32, #tpu.memory_space<vmem>>, vector<1x64xf32>
    %62 = arith.truncf %59 : vector<16x32xf32> to vector<16x32xbf16>
    %cst_28 = arith.constant dense<0.000000e+00> : vector<16x64xf32>
    %63 = tpu.matmul %62, %60, %cst_28 {dimension_numbers = #tpu.dot_dimension_numbers<[1], [0], [0], [1], [0, 0, 1, 1], [], []>} : vector<16x32xbf16>, vector<32x64xbf16>, vector<16x64xf32> -> vector<16x64xf32>
    %64 = vector.broadcast %61 : vector<1x64xf32> to vector<16x64xf32>
    %65 = arith.addf %63, %64 : vector<16x64xf32>
    %cst_29 = arith.constant 0.000000e+00 : f32
    %66 = vector.broadcast %cst_29 : f32 to vector<16x64xf32>
    %67 = arith.maximumf %65, %66 : vector<16x64xf32>
    %c0_30 = arith.constant 0 : index
    %c0_31 = arith.constant 0 : index
    %68 = vector.load %arg8[%c0_30, %c0_31] : memref<64x128xbf16, #tpu.memory_space<vmem>>, vector<64x128xbf16>
    %c5 = arith.constant 5 : index
    %c0_32 = arith.constant 0 : index
    %69 = vector.load %arg9[%c5, %c0_32] : memref<8x128xf32, #tpu.memory_space<vmem>>, vector<1x128xf32>
    %70 = arith.truncf %67 : vector<16x64xf32> to vector<16x64xbf16>
    %cst_33 = arith.constant dense<0.000000e+00> : vector<16x128xf32>
    %71 = tpu.matmul %70, %68, %cst_33 {dimension_numbers = #tpu.dot_dimension_numbers<[1], [0], [0], [1], [0, 0, 1, 1], [], []>} : vector<16x64xbf16>, vector<64x128xbf16>, vector<16x128xf32> -> vector<16x128xf32>
    %72 = vector.broadcast %69 : vector<1x128xf32> to vector<16x128xf32>
    %73 = arith.addf %71, %72 : vector<16x128xf32>
    %74 = arith.negf %73 : vector<16x128xf32>
    %75 = math.exp %74 : vector<16x128xf32>
    %cst_34 = arith.constant 1.000000e+00 : f32
    %76 = vector.broadcast %cst_34 : f32 to vector<16x128xf32>
    %77 = arith.addf %76, %75 : vector<16x128xf32>
    %78 = arith.divf %76, %77 : vector<16x128xf32>
    %c0_35 = arith.constant 0 : index
    %c0_36 = arith.constant 0 : index
    %79 = vector.load %arg10[%c0_35, %c0_36] : memref<16x128xf32, #tpu.memory_space<vmem>>, vector<16x128xf32>
    tpu.vector_store %arg10[%c0_35, %c0_36], %78 {strides = array<i32>} : memref<16x128xf32, #tpu.memory_space<vmem>>, vector<16x128xf32>,
    %c0_37 = arith.constant 0 : index
    %c0_38 = arith.constant 0 : index
    %80 = vector.load %arg11[%c0_37, %c0_38] : memref<16x128xf32, #tpu.memory_space<vmem>>, vector<16x128xf32>
    tpu.vector_store %arg11[%c0_37, %c0_38], %43 {strides = array<i32>} : memref<16x128xf32, #tpu.memory_space<vmem>>, vector<16x128xf32>,
    return
  }
  func.func @transform_0(%arg0: i32) -> (i32, i32) {
    %c0_i32 = arith.constant 0 : i32
    %c0_i32_0 = arith.constant 0 : i32
    return %arg0, %c0_i32 : i32, i32
  }
  func.func @transform_1(%arg0: i32) -> (i32, i32) {
    %c0_i32 = arith.constant 0 : i32
    %c0_i32_0 = arith.constant 0 : i32
    return %arg0, %c0_i32 : i32, i32
  }
  func.func @transform_2(%arg0: i32) -> (i32, i32) {
    %c0_i32 = arith.constant 0 : i32
    %c0_i32_0 = arith.constant 0 : i32
    %c0_i32_1 = arith.constant 0 : i32
    return %c0_i32, %c0_i32_0 : i32, i32
  }
  func.func @transform_3(%arg0: i32) -> (i32, i32) {
    %c0_i32 = arith.constant 0 : i32
    %c0_i32_0 = arith.constant 0 : i32
    %c0_i32_1 = arith.constant 0 : i32
    return %c0_i32, %c0_i32_0 : i32, i32
  }
  func.func @transform_4(%arg0: i32) -> (i32, i32) {
    %c0_i32 = arith.constant 0 : i32
    %c0_i32_0 = arith.constant 0 : i32
    %c0_i32_1 = arith.constant 0 : i32
    return %c0_i32, %c0_i32_0 : i32, i32
  }
  func.func @transform_5(%arg0: i32) -> (i32, i32) {
    %c0_i32 = arith.constant 0 : i32
    %c0_i32_0 = arith.constant 0 : i32
    %c0_i32_1 = arith.constant 0 : i32
    return %c0_i32, %c0_i32_0 : i32, i32
  }
  func.func @transform_6(%arg0: i32) -> (i32, i32) {
    %c0_i32 = arith.constant 0 : i32
    %c0_i32_0 = arith.constant 0 : i32
    %c0_i32_1 = arith.constant 0 : i32
    return %c0_i32, %c0_i32_0 : i32, i32
  }
  func.func @transform_7(%arg0: i32) -> (i32, i32) {
    %c0_i32 = arith.constant 0 : i32
    %c0_i32_0 = arith.constant 0 : i32
    %c0_i32_1 = arith.constant 0 : i32
    return %c0_i32, %c0_i32_0 : i32, i32
  }
  func.func @transform_8(%arg0: i32) -> (i32, i32) {
    %c0_i32 = arith.constant 0 : i32
    %c0_i32_0 = arith.constant 0 : i32
    %c0_i32_1 = arith.constant 0 : i32
    return %c0_i32, %c0_i32_0 : i32, i32
  }
  func.func @transform_9(%arg0: i32) -> (i32, i32) {
    %c0_i32 = arith.constant 0 : i32
    %c0_i32_0 = arith.constant 0 : i32
    return %arg0, %c0_i32 : i32, i32
  }
  func.func @transform_10(%arg0: i32) -> (i32, i32) {
    %c0_i32 = arith.constant 0 : i32
    %c0_i32_0 = arith.constant 0 : i32
    return %arg0, %c0_i32 : i32, i32
  }
}

</mosaic_0001>

<bundles_post_ra>
// kernel: tpu_custom_call.1
= control target key start
LH: loop header
LB: loop body
LE: loop exit
PB: predicated region body
PF: predicated region fallthrough
CT: control target
= control target key end

     0   :  { %s1861_s0 = inlined_call_operand.vmem [shape: f32[40,128], index: 0, kind: input, shape index: {}]   ;;  %s1862_s1 = inlined_call_operand.vmem [shape: f32[40,16], index: 1, kind: input, shape index: {}]   ;;  %s1863_s2 = inlined_call_operand.vmem [shape: bf16[128,64], index: 2, kind: input, shape index: {}]   ;;  %s1864_s3 = inlined_call_operand.vmem [shape: bf16[64,32], index: 3, kind: input, shape index: {}]   ;;  %s1865_s4 = inlined_call_operand.vmem [shape: bf16[32,128], index: 4, kind: input, shape index: {}]   ;;  %s1866_s5 = inlined_call_operand.vmem [shape: bf16[16,32], index: 5, kind: input, shape index: {}]   ;;  %s1867_s6 = inlined_call_operand.vmem [shape: bf16[32,64], index: 6, kind: input, shape index: {}]   ;;  %s1868_s7 = inlined_call_operand.vmem [shape: bf16[64,128], index: 7, kind: input, shape index: {}]   ;;  %s1869_s8 = inlined_call_operand.vmem [shape: f32[8,128], index: 8, kind: input, shape index: {}]   ;;  %s1870_s9 = inlined_call_operand.hbm [shape: f32[40,128], index: 9, kind: output, shape index: {0}]   ;;  %s1871_s10 = inlined_call_operand.hbm [shape: f32[40,128], index: 10, kind: output, shape index: {1}]  }
   0x1   :  { %1873 = sst [smem:[#allocation9_spill]] %s1861_s0 }
   0x2   :  { %1874 = sst [smem:[#allocation10_spill]] %s1862_s1 }
   0x3   :  { %16 = vsyncpa [#allocation3], 0 }
   0x4   :  { %18 = vsyncpa [#allocation3 + $0x1], 0 }
   0x5   :  { %19 = vsyncpa [#allocation5], 0 }
   0x6   :  { %21 = vsyncpa [#allocation5 + $0x1], 0  ;;  %s1559_s13 = smov 0   ;;  %s1561_s14 = smov 0  }
   0x7   :  { %s1563_s15 = smov 0   ;;  %s1565_s16 = smov 0  }
   0x8 LB: > { %s1580_s17 = sadd.s32 4294967295, %s1493_s16   ;;  %s1154_s18 = sadd.s32 4294967294, %s1493_s16   ;;  %s1493_s16 = sphi %s1565_s16, %s1887_s16   ;;  %s1489_s15 = sphi %s1563_s15, %s1886_s15   ;;  %s1485_s14 = sphi %s1561_s14, %s1885_s14   ;;  %s1481_s13 = sphi %s1559_s13, %s1884_s13  }
   0x9   : > { %s1584_s19 = sadd.s32 1, %s1493_s16   ;;  %s233_s20 = sadd.s32 1, %s1489_s15 }
   0xa   : > { %s230_s21 = ssub.s32 %s1493_s16, %s1584_s19  ;;  %p243_p0 = scmp.ne.s32.totalorder %s1489_s15, %s1485_s14 }
   0xb   : > { %p231_p1 = scmp.eq.s32.totalorder %s230_s21, 0  ;;  %p244_p2 = scmp.eq.s32.totalorder %s1580_s17, 2 }
   0xc   : > { %p249_p3 = scmp.ne.s32.totalorder %s1485_s14, %s1481_s13  ;;  %p250_p4 = scmp.eq.s32.totalorder %s1154_s18, 2 }
   0xd   : > { %s1595_s22 = scalar_select %p231_p1, %s1489_s15, %s233_s20  }
   0xe   : > { %p1597_p5 = por %p244_p2, %p243_p0  ;;  %p1601_p6 = por %p250_p4, %p249_p3 }
   0xf   : > { %1875 = sst [smem:[#allocation8_spill]] %s1595_s22  ;;  %p1157_p7 = scmp.ge.s32.totalorder %s1493_s16, 1 }
  0x10   : > { %p349_p8 = scmp.lt.s32.totalorder %s1493_s16, 4 }
  0x12   : > { %p350_p9 = pnand %p1157_p7, %p349_p8 }
  0x13   : > { %v1358_v0 = vld [vmem:[%s1863_s2] sm:$0xff] (!%p350_p9)   ;;  %v1495_v1 = vmov (!%p350_p9), 0.0   ;;  %v1359_v2 = vld [vmem:[%s1863_s2 + $0x8] sm:$0xff] (!%p350_p9)   ;;  %vm1496_vm0 = vmmov (!%p350_p9), 0   ;;  %s1619_s29 = sshll.u32 (!%p350_p9), %s1580_s17, 1  ;;  %v1360_v3 = vld [vmem:[%s1863_s2 + $0x10] sm:$0xff] (!%p350_p9)   ;;  %v711_v55 = vlaneseq (!%p350_p9) }
  0x14   : > { %353 = sbr.rel (%p350_p9) target bundleno = 1631 (0x65f), region = 56  ;;  %1243 = vmatprep.subr.bf16.mxu0 (!%p350_p9), %v1495_v1  ;;  %1263 = vmatprep.subr.bf16.mxu1 (!%p350_p9), %v1495_v1  ;;  %p410_p10 = scmp.lt.s32.totalorder (!%p350_p9), %s1619_s29, 4  ;;  %v1366_v4 = vld [vmem:[%s1864_s3] sm:$0xff] (!%p350_p9)   ;;  %v1361_v5 = vld [vmem:[%s1863_s2 + $0x18] sm:$0xff] (!%p350_p9)   ;;  %v1367_v6 = vld [vmem:[%s1864_s3 + $0x8] sm:$0xff] (!%p350_p9)   ;;  %vm597_vm1 = vcmask (!%p350_p9), 523264  }
  0x15   : > { %1244 = vmatpush3.bf16.msra.mxu0 (!%p350_p9), %v1358_v0  ;;  %1259 = vmatprep.mubr.msk.bf16.mxu0 (!%p350_p9), %vm1496_vm0, %v1495_v1  ;;  %v1362_v7 = vld [vmem:[%s1863_s2 + $0x20] sm:$0xff] (!%p350_p9)   ;;  %v1363_v8 = vld [vmem:[%s1863_s2 + $0x28] sm:$0xff] (!%p350_p9)   ;;  %v1364_v9 = vld [vmem:[%s1863_s2 + $0x30] sm:$0xff] (!%p350_p9)   ;;  %s1878_s0 = sld [smem:[#allocation9_spill]] (!%p350_p9)  ;;  %vm666_vm2 = vcmask (!%p350_p9), 261120   ;;  %s1697_s20 = sand.u32 (!%p350_p9), 1, %s1485_s14  }
  0x16   : > { %1245 = vmatprep.subr.bf16.mxu0 (!%p350_p9), %v1495_v1  ;;  %1271 = vmatprep.mubr.msk.bf16.mxu1 (!%p350_p9), %vm1496_vm0, %v1495_v1  ;;  %v1365_v10 = vld [vmem:[%s1863_s2 + $0x38] sm:$0xff] (!%p350_p9)   ;;  %v1368_v14 = vld [vmem:[%s1864_s3 + $0x10] sm:$0xff] (!%p350_p9)   ;;  %v1164_v16 = vld [vmem:[%s1869_s8] ss:$0 sm:$0xff] (!%p350_p9)  ;;  %v712_v58 = vand.u32 (!%p350_p9), 127, %v711_v55  ;;  %s1158_s27 = sshll.u32 (!%p350_p9), %s1697_s20, 4 }
  0x17   : > { %1264 = vmatpush3.bf16.msra.mxu1 (!%p350_p9), %v1366_v4  ;;  %v1369_v15 = vld [vmem:[%s1864_s3 + $0x18] sm:$0xff] (!%p350_p9)   ;;  %v1370_v26 = vld [vmem:[%s1865_s4] sm:$0xff] (!%p350_p9)   ;;  %v1371_v27 = vld [vmem:[%s1865_s4 + $0x8] sm:$0xff] (!%p350_p9)   ;;  %s1497_s12 = smov (!%p350_p9), 112   ;;  %s1879_s1 = sld [smem:[#allocation10_spill]] (!%p350_p9)  ;;  %vm788_vm10 = vcmask (!%p350_p9), 130048  }
  0x18   : > { %1265 = vmatprep.subr.bf16.mxu1 (!%p350_p9), %v1495_v1  ;;  %v1173_v28 = vld [vmem:[%s1869_s8 + $0x1] ss:$0 sm:$0xff] (!%p350_p9)  ;;  %v1179_v38 = vld [vmem:[%s1869_s8 + $0x2] ss:$0 sm:$0xff] (!%p350_p9)  ;;  %vm713_vm3 = vcmp.ge.s32.totalorder (!%p350_p9), %v712_v58, 16  ;;  %vm714_vm4 = vcmp.lt.s32.totalorder (!%p350_p9), %v712_v58, 32 }
  0x19   : > { %1246 = vmatpush3.bf16.msra.mxu0 (!%p350_p9), %v1359_v2  ;;  %vm715_vm6 = vmand (!%p350_p9), %vm713_vm3, %vm714_vm4  ;;  %s1872_s11 = scalar_lea.sflag (!%p350_p9), [#allocation3], %s1697_s20 }
  0x1a   : > { %1247 = vmatprep.subr.bf16.mxu0 (!%p350_p9), %v1495_v1 }
  0x1b   : > { %s1635_s25 = scalar_select %p410_p10, %s1619_s29, 4  ;;  %1266 = vmatpush3.bf16.msra.mxu1 %v1367_v6 }
  0x1c   : > { %1267 = vmatprep.subr.bf16.mxu1 %v1495_v1  ;;  %s1015_s22 = ssub.s32 (%p1597_p5), 5, %s1619_s29 }
  0x1d   : > { %1248 = vmatpush3.bf16.msra.mxu0 %v1360_v3  ;;  %s1161_s18 = sshll.u32 %s1635_s25, 3  ;;  %p1016_p11 = scmp.lt.s32.totalorder (%p1597_p5), %s1015_s22, 2 }
  0x1e   : > { %1249 = vmatprep.subr.bf16.mxu0 %v1495_v1  ;;  %s413_s28 = scalar_lea.vmem %s1878_s0, %s1161_s18  ;;  %s427_s26 = scalar_lea.vmem %s1879_s1, %s1161_s18 }
  0x1f   : > { %v444_v11 = vld [vmem:[%s413_s28] sm:$0xff]  ;;  %v445_v12 = vld [vmem:[%s413_s28 + $0x8] sm:$0xff]  ;;  %1268 = vmatpush3.bf16.msra.mxu1 %v1368_v14  ;;  %s1705_s28 = scalar_lea.vmem [#allocation4], %s1158_s27  ;;  %s397_s18 = scalar_lea.vmem [#allocation2], %s1158_s27 }
  0x20   : > { %v463_v13 = vpack.c.bf16 %v445_v12, %v444_v11  ;;  %1269 = vmatprep.subr.bf16.mxu1 %v1495_v1 }
  0x21   : > { %1250 = vmatpush3.bf16.msra.mxu0 %v1361_v5 }
  0x22   : > { %1251 = vmatprep.subr.bf16.mxu0 %v1495_v1 }
  0x23   : > { %1270 = vmatpush3.bf16.msra.mxu1 %v1369_v15 }
  0x24   : > { %1275 = vmatprep.subr.bf16.mxu1 %v1495_v1 }
  0x25   : > { %1252 = vmatpush3.bf16.msra.mxu0 %v1362_v7 }
  0x26   : > { %1253 = vmatprep.subr.bf16.mxu0 %v1495_v1 }
  0x29   : > { %1254 = vmatpush3.bf16.msra.mxu0 %v1363_v8 }
  0x2a   : > { %1255 = vmatprep.subr.bf16.mxu0 %v1495_v1 }
  0x2d   : > { %1256 = vmatpush3.bf16.msra.mxu0 %v1364_v9 }
  0x2e   : > { %1257 = vmatprep.subr.bf16.mxu0 %v1495_v1 }
  0x31   : > { %1258 = vmatpush3.bf16.msra.mxu0 %v1365_v10 }
  0x32   : > { %1289 = vmatprep.subr.bf16.mxu0 %v1495_v1 }
  0x34   : > { %1260 = vmatmul.mubr.bf16.vlgmr.msra.gmra.mrb[0].mxu0 %v463_v13 }
  0x35   : > { %1293 = vmatprep.mubr.msk.bf16.mxu0 %vm1496_vm0, %v1495_v1 }
 0x107   : > { %v550_v17 = vpop.f32.mrb[0].mxu0 }
 0x108   : > { %v551_v18 = vadd.f32 %v1164_v16, %v550_v17  ;;  %v1261_v19 = vpop.f32.mrb[1].mxu0 }
 0x109   : > { %v553_v20 = vpop.f32.mrb[2].mxu0 }
 0x10a   : > { %v554_v21 = vadd.f32 %v1164_v16, %v553_v20  ;;  %v1262_v22 = vpop.f32.mrb[3].mxu0  ;;  %v557_v23 = vmax.f32 %v551_v18, 0.0  ;;  %v1372_v20 = vld [vmem:[%s1866_s5] sm:$0xff]  }
 0x10c   : > { %v558_v24 = vmax.f32 %v554_v21, 0.0 }
 0x10e   : > { %v568_v25 = vpack.c.bf16 %v558_v24, %v557_v23  ;;  %v754_v23 = vld [vmem:[%s427_s26] sm:$0xff] }
 0x110   : > { %1272 = vmatmul.mubr.msk.bf16.vlgmr.msra.gmra.mrb[0].mxu1 %vm597_vm1, %v568_v25  ;;  %v755_v25 = vld [vmem:[%s427_s26 + $0x8] sm:$0xff] }
 0x111   : > { %1279 = vmatprep.mubr.msk.bf16.mxu1 %vm1496_vm0, %v1495_v1  ;;  %1276 = vmatpush3.bf16.msra.mxu1 %v1370_v26 }
 0x112   : > { %1277 = vmatprep.subr.bf16.mxu1 %v1495_v1 }
 0x115   : > { %1278 = vmatpush3.bf16.msra.mxu1 %v1371_v27 }
 0x116   : > { %1283 = vmatprep.subr.bf16.mxu1 %v1495_v1 }
 0x1e3   : > { %v635_v29 = vpop.f32.mrb[0].mxu1 }
 0x1e4   : > { %v636_v30 = vadd.f32 %v1173_v28, %v635_v29  ;;  %v1273_v31 = vpop.f32.mrb[1].mxu1 }
 0x1e5   : > { %v638_v32 = vpop.f32.mrb[2].mxu1 }
 0x1e6   : > { %v639_v33 = vadd.f32 %v1173_v28, %v638_v32  ;;  %v1274_v34 = vpop.f32.mrb[3].mxu1  ;;  %v642_v35 = vmax.f32 %v636_v30, 0.0  ;;  %v1373_v32 = vld [vmem:[%s1867_s6] sm:$0xff]  }
 0x1e7   : > { %1290 = vmatpush3.bf16.msra.mxu0 %v1373_v32  ;;  %v1375_v34 = vld [vmem:[%s1868_s7] sm:$0xff]  }
 0x1e8   : > { %v643_v36 = vmax.f32 %v639_v33, 0.0  ;;  %1291 = vmatprep.subr.bf16.mxu0 %v1495_v1  ;;  %v1374_v33 = vld [vmem:[%s1867_s6 + $0x8] sm:$0xff]  }
 0x1ea   : > { %v649_v37 = vpack.c.bf16 %v643_v36, %v642_v35  ;;  %v1376_v35 = vld [vmem:[%s1868_s7 + $0x8] sm:$0xff]   ;;  %v1183_v36 = vld [vmem:[%s1869_s8 + $0x3] ss:$0 sm:$0xff] }
 0x1eb   : > { %1292 = vmatpush3.bf16.msra.mxu0 %v1374_v33 }
 0x1ec   : > { %1280 = vmatmul.mubr.msk.bf16.vlgmr.msra.gmra.mrb[4].mxu1 %vm666_vm2, %v649_v37 }
 0x1ed   : > { %1285 = vmatprep.mubr.msk.bf16.mxu1 %vm1496_vm0, %v1495_v1  ;;  %1284 = vmatpush3.bf16.msra.mxu1 %v1372_v20 }
 0x1ee   : > { %1297 = vmatprep.subr.bf16.mxu1 %v1495_v1 }
 0x2bf   : > { %v704_v39 = vpop.f32.mrb[4].mxu1 }
 0x2c0   : > { %v705_v40 = vadd.f32 %v1179_v38, %v704_v39  ;;  %v1281_v41 = vpop.f32.mrb[5].mxu1 }
 0x2c1   : > { %v707_v42 = vpop.f32.mrb[6].mxu1 }
 0x2c2   : > { %v722_v43 = vand.u32 2147483647, %v705_v40  ;;  %v708_v44 = vadd.f32 %v1179_v38, %v707_v42  ;;  %v1282_v45 = vpop.f32.mrb[7].mxu1  ;;  %v716_v4 = vmax.f32 %v705_v40, 0.0  ;;  %vm718_vm8 = vcmp.ne.f32.partialorder %v705_v40, %v705_v40 }
 0x2c4   : > { %v724_v46 = vsub.f32 0.0, %v722_v43  ;;  %v723_v47 = vand.u32 2147483647, %v708_v44  ;;  %v717_v9 = vmax.f32 %v708_v44, 0.0  ;;  %vm719_vm9 = vcmp.ne.f32.partialorder %v708_v44, %v708_v44 }
 0x2c6   : > { %v726_v48 = vmul.f32 1.442695, %v724_v46  ;;  %v725_v49 = vsub.f32 0.0, %v723_v47  ;;  %v1377_v46 = vld [vmem:[%s1868_s7 + $0x10] sm:$0xff]   ;;  %v1378_v47 = vld [vmem:[%s1868_s7 + $0x18] sm:$0xff]  }
 0x2c8   : > { %1379 = vpow2.f32 %v726_v48  ;;  %v728_v50 = vmul.f32 1.442695, %v725_v49  ;;  %v1186_v48 = vld [vmem:[%s1869_s8 + $0x4] ss:$0 sm:$0xff] }
 0x2ca   : > { %1381 = vpow2.f32 %v728_v50 }
 0x2d2   : > { %v1380_v51 = vpop.eup %1379 }
 0x2d3   : > { %v730_v52 = vadd.f32 1.0, %v1380_v51  ;;  %v733_v56 = vmul.f32 -0.5, %v1380_v51  ;;  %v736_v60 = vand.u32 2147483647, %v1380_v51 }
 0x2d4   : > { %v1382_v53 = vpop.eup %1381 }
 0x2d5   : > { %1383 = vlog2.f32 %v730_v52  ;;  %v739_v54 = vadd.f32 1.0, %v1382_v53  ;;  %v742_v57 = vmul.f32 -0.5, %v1382_v53  ;;  %v734_v59 = vadd.f32 1.0, %v733_v56 }
 0x2d6   : > { %v745_v63 = vand.u32 2147483647, %v1382_v53  ;;  %vm737_vm5 = vcmp.lt.f32.partialorder %v736_v60, 0.0004427343 }
 0x2d7   : > { %1385 = vlog2.f32 %v739_v54  ;;  %v743_v61 = vadd.f32 1.0, %v742_v57  ;;  %v735_v2 = vmul.f32 %v1380_v51, %v734_v59 }
 0x2d8   : > { %vm746_vm7 = vcmp.lt.f32.partialorder %v745_v63, 0.0004427343 }
 0x2d9   : > { %v744_v7 = vmul.f32 %v1382_v53, %v743_v61 }
 0x2df   : > { %v1384_v62 = vpop.eup %1383 }
 0x2e0   : > { %v732_v0 = vmul.f32 0.6931472, %v1384_v62 }
 0x2e1   : > { %v1386_v3 = vpop.eup %1385 }
 0x2e2   : > { %v738_v5 = vsel %vm737_vm5, %v735_v2, %v732_v0  ;;  %v741_v6 = vmul.f32 0.6931472, %v1386_v3 }
 0x2e3   : > { %v748_v8 = vadd.f32 %v738_v5, %v716_v4 }
 0x2e4   : > { %v747_v10 = vsel %vm746_vm7, %v744_v7, %v741_v6 }
 0x2e5   : > { %v750_v11 = vsel %vm718_vm8, %v705_v40, %v748_v8  ;;  %v749_v12 = vadd.f32 %v747_v10, %v717_v9 }
 0x2e6   : > { %v752_v13 = vsel %vm715_vm6, %v750_v11, %v705_v40 }
 0x2e7   : > { %999 = vst [vmem:[%s1705_s28] sm:$0xff] %v752_v13  ;;  %v751_v14 = vsel %vm719_vm9, %v708_v44, %v749_v12  ;;  %v756_v15 = vmul.f32 0.5, %v752_v13 }
 0x2e8   : > { %v753_v16 = vsel %vm715_vm6, %v751_v14, %v708_v44 }
 0x2e9   : > { %v757_v17 = vmul.f32 0.5, %v753_v16  ;;  %1000 = vst [vmem:[%s1705_s28 + $0x8] sm:$0xff] %v753_v16  ;;  %v758_v18 = vmul.f32 1.442695, %v756_v15 }
 0x2eb   : > { %v760_v19 = vmul.f32 1.442695, %v757_v17  ;;  %1387 = vpow2.f32 %v758_v18 }
 0x2ed   : > { %1389 = vpow2.f32 %v760_v19 }
 0x2f5   : > { %v1388_v21 = vpop.eup %1387 }
 0x2f6   : > { %764 = vrot.lane.b32.xlu0 %v1388_v21, %s1497_s12 }
 0x2f7   : > { %v1390_v22 = vpop.eup %1389 }
 0x2fa   : > { %766 = vrot.lane.b32.xlu0 %v1390_v22, %s1497_s12 }
 0x368   : > { %v765_v24 = vpop.permute.xlu0 %764 }
 0x369   : > { %v770_v26 = vmul.f32 %v765_v24, %v754_v23 }
 0x36b   : > { %v772_v29 = vadd.f32 %v770_v26, %v752_v13 }
 0x36c   : > { %v767_v27 = vpop.permute.xlu0 %766 }
 0x36d   : > { %v771_v28 = vmul.f32 %v767_v27, %v755_v25 }
 0x36f   : > { %v773_v30 = vadd.f32 %v771_v28, %v753_v16 }
 0x371   : > { %v777_v31 = vpack.c.bf16 %v773_v30, %v772_v29 }
 0x373   : > { %1286 = vmatmul.mubr.msk.bf16.vlgmr.msra.gmra.mrb[8].mxu1 %vm788_vm10, %v777_v31 }
 0x374   : > { %1305 = vmatprep.mubr.msk.bf16.mxu1 %vm1496_vm0, %v1495_v1  ;;  %1298 = vmatpush3.bf16.msra.mxu1 %v1375_v34 }
 0x375   : > { %1299 = vmatprep.subr.bf16.mxu1 %v1495_v1 }
 0x378   : > { %1300 = vmatpush3.bf16.msra.mxu1 %v1376_v35 }
 0x379   : > { %1301 = vmatprep.subr.bf16.mxu1 %v1495_v1 }
 0x37c   : > { %1302 = vmatpush3.bf16.msra.mxu1 %v1377_v46 }
 0x37d   : > { %1303 = vmatprep.subr.bf16.mxu1 %v1495_v1  ;;  %v1190_v1 = vld [vmem:[%s1869_s8 + $0x5] ss:$0 sm:$0xff] }
 0x380   : > { %1304 = vmatpush3.bf16.msra.mxu1 %v1378_v47 }
 0x446   : > { %v826_v37 = vpop.f32.mrb[8].mxu1 }
 0x447   : > { %v827_v38 = vadd.f32 %v1183_v36, %v826_v37  ;;  %v1287_v39 = vpop.f32.mrb[9].mxu1 }
 0x448   : > { %v829_v40 = vpop.f32.mrb[10].mxu1 }
 0x449   : > { %v830_v41 = vadd.f32 %v1183_v36, %v829_v40  ;;  %v1288_v42 = vpop.f32.mrb[11].mxu1  ;;  %v833_v43 = vmax.f32 %v827_v38, 0.0 }
 0x44b   : > { %v834_v44 = vmax.f32 %v830_v41, 0.0 }
 0x44d   : > { %v840_v45 = vpack.c.bf16 %v834_v44, %v833_v43 }
 0x44f   : > { %1294 = vmatmul.mubr.msk.bf16.vlgmr.msra.gmra.mrb[4].mxu0 %vm666_vm2, %v840_v45 }
 0x522   : > { %v894_v49 = vpop.f32.mrb[4].mxu0 }
 0x523   : > { %v895_v50 = vadd.f32 %v1186_v48, %v894_v49  ;;  %v1295_v51 = vpop.f32.mrb[5].mxu0 }
 0x524   : > { %v897_v52 = vpop.f32.mrb[6].mxu0 }
 0x525   : > { %v898_v53 = vadd.f32 %v1186_v48, %v897_v52  ;;  %v1296_v54 = vpop.f32.mrb[7].mxu0  ;;  %v901_v55 = vmax.f32 %v895_v50, 0.0 }
 0x527   : > { %v902_v56 = vmax.f32 %v898_v53, 0.0 }
 0x529   : > { %v912_v57 = vpack.c.bf16 %v902_v56, %v901_v55 }
 0x52b   : > { %1306 = vmatmul.mubr.msk.bf16.vlgmr.msra.gmra.mrb[12].mxu1 %vm597_vm1, %v912_v57 }
 0x5fe   : > { %v978_v58 = vpop.f32.mrb[12].mxu1 }
 0x5ff   : > { %v979_v59 = vadd.f32 %v1190_v1, %v978_v58  ;;  %v1307_v60 = vpop.f32.mrb[13].mxu1 }
 0x600   : > { %v981_v61 = vpop.f32.mrb[14].mxu1 }
 0x601   : > { %v1196_v62 = vmul.f32 -1.442695, %v979_v59  ;;  %v982_v63 = vadd.f32 %v1190_v1, %v981_v61  ;;  %v1308_v0 = vpop.f32.mrb[15].mxu1 }
 0x603   : > { %1391 = vpow2.f32 %v1196_v62  ;;  %v1197_v2 = vmul.f32 -1.442695, %v982_v63 }
 0x605   : > { %1393 = vpow2.f32 %v1197_v2 }
 0x60d   : > { %v1392_v3 = vpop.eup %1391 }
 0x60e   : > { %v991_v4 = vadd.f32 1.0, %v1392_v3 }
 0x60f   : > { %v1394_v5 = vpop.eup %1393 }
 0x610   : > { %1395 = vrcp.f32 %v991_v4  ;;  %v992_v6 = vadd.f32 1.0, %v1394_v5 }
 0x612   : > { %1397 = vrcp.f32 %v992_v6 }
 0x617   : > { %1013 = sbr.rel (!%p1597_p5) target bundleno = 1595 (0x63b), region = 60 }
 0x61a   : > { %v1396_v7 = vpop.eup %1395 }
 0x61b   : > { %997 = vst [vmem:[%s397_s18] sm:$0xff] %v1396_v7 }
 0x61c   : > { %v1398_v8 = vpop.eup %1397 }
 0x61d   : > { %998 = vst [vmem:[%s397_s18 + $0x8] sm:$0xff] %v1398_v8 }
 0x61e   : > { %s1889_s22 = smov (!%p1016_p11, %s1015_s22), 2 }
 0x61f   : > { %s1760_s21 = sshll.u32 %s1889_s22, 7 }
 0x620   : > { %s1020_s26 = ssub.s32 256, %s1760_s21 }
 0x621   : > { %1021 = vsyncadd %s1872_s11, %s1020_s26  ;;  %p1202_p12 = scmp.ne.s32.totalorder %s1760_s21, 0  ;;  %s1214_s27 = sshll.u32 %s1580_s17, 8 }
 0x622   : > { %s1770_s12 = scalar_lea.hbm %s1870_s9, %s1214_s27  ;;  %s1026_s0 = sshll.u32 %s397_s18, 4  ;;  %s1772_s0 = int_to_ptr.vmem [resolvable:$true] %s1026_s0 }
 0x623   : > { %s1399_s22 = scalar_lea.vmem %s1772_s0, %s1760_s21  ;;  %s1498_s26 = smov [#allocation2]  }
 0x624   : > { %p1400_p13 = scmp.ne.s32.totalorder %s1772_s0, %s1399_s22  ;;  %s1403_s11 = sshll.u32 %s1498_s26, 4  ;;  %s1404_s11 = int_to_ptr.vmem [resolvable:$false] %s1403_s11 }
 0x625   : > { %s1405_s1 = scalar_lea.vmem %s1404_s11, 512  ;;  %p1406_p2 = scmp.lt.s32.totalorder %s1772_s0, %s1404_s11 }
 0x626   : > { %p1401_p0 = pnand %p1400_p13, %p1202_p12  ;;  %p1407_p3 = scmp.lt.s32.totalorder %s1405_s1, %s1399_s22 }
 0x628   : > { %p1402_p1 = pneg %p1401_p0  ;;  %p1408_p4 = por %p1407_p3, %p1406_p2 }
 0x62a   : > { %p1409_p7 = pnand %p1408_p4, %p1402_p1 }
 0x62c   : > { %1412 = shalt.err (!%p1409_p7)
}
 0x62d   : > { %s1413_s18 = scalar_lea.hbm %s1770_s12, %s1760_s21  ;;  %s1417_s25 = scalar_lea.hbm %s1870_s9, 640 }
 0x62e   : > { %p1414_p8 = scmp.ne.s32.totalorder %s1770_s12, %s1413_s18  ;;  %p1418_p11 = scmp.lt.u32.totalorder %s1770_s12, %s1870_s9 }
 0x62f   : > { %p1419_p13 = scmp.lt.u32.totalorder %s1417_s25, %s1413_s18  ;;  %p1421_p1 = scmp.lt.u32.totalorder %s1413_s18, %s1770_s12 }
 0x630   : > { %p1415_p9 = pnand %p1414_p8, %p1202_p12 }
 0x631   : > { %p1420_p0 = por %p1419_p13, %p1418_p11 }
 0x632   : > { %p1416_p10 = pneg %p1415_p9 }
 0x633   : > { %p1422_p2 = por %p1421_p1, %p1420_p0 }
 0x635   : > { %p1423_p3 = pnand %p1422_p2, %p1416_p10 }
 0x637   : > { %1426 = shalt.err (!%p1423_p3)
}
 0x638   : > { %s1499_s22 = smov 128   ;;  %s1500_s26 = smov 8  }
 0x639   : > { %s1880_s27 = scalar_lea.sflag [#allocation3], %s1697_s20 }
 0x63a   : > { %1032 = dma.vmem_to_hbm [thread:$0]  (%p1202_p12), %s1772_s0, %s1760_s21, %s1770_s12, %s1880_s27, %s1499_s22, %s1499_s22, %s1500_s26  }
 0x63b PF: > { %1035 = sbr.rel (!%p1597_p5) target bundleno = 1631 (0x65f), region = 64  ;;  %s1037_s18 = ssub.s32 (%p1597_p5), 5, %s1619_s29 }
 0x63c   : > { %p1038_p4 = scmp.lt.s32.totalorder (%p1597_p5), %s1037_s18, 2  ;;  %s1881_s11 = scalar_lea.sflag (%p1597_p5), [#allocation5], %s1697_s20 }
 0x642   : > { %s1891_s18 = smov (!%p1038_p4, %s1037_s18), 2 }
 0x643   : > { %s1803_s30 = sshll.u32 %s1891_s18, 7 }
 0x644   : > { %s1042_s25 = ssub.s32 256, %s1803_s30 }
 0x645   : > { %1043 = vsyncadd %s1881_s11, %s1042_s25  ;;  %p1208_p12 = scmp.ne.s32.totalorder %s1803_s30, 0  ;;  %s1215_s0 = sshll.u32 %s1580_s17, 8 }
 0x646   : > { %s1813_s21 = scalar_lea.hbm %s1871_s10, %s1215_s0  ;;  %s1048_s29 = sshll.u32 %s1705_s28, 4  ;;  %s1816_s29 = int_to_ptr.vmem [resolvable:$true] %s1048_s29 }
 0x647   : > { %s1427_s1 = scalar_lea.vmem %s1816_s29, %s1803_s30  ;;  %s1501_s22 = smov [#allocation4]  }
 0x648   : > { %p1428_p5 = scmp.ne.s32.totalorder %s1816_s29, %s1427_s1  ;;  %s1431_s26 = sshll.u32 %s1501_s22, 4  ;;  %s1432_s26 = int_to_ptr.vmem [resolvable:$false] %s1431_s26 }
 0x649   : > { %s1433_s17 = scalar_lea.vmem %s1432_s26, 512  ;;  %p1434_p9 = scmp.lt.s32.totalorder %s1816_s29, %s1432_s26 }
 0x64a   : > { %p1429_p7 = pnand %p1428_p5, %p1208_p12  ;;  %p1435_p10 = scmp.lt.s32.totalorder %s1433_s17, %s1427_s1 }
 0x64c   : > { %p1430_p8 = pneg %p1429_p7  ;;  %p1436_p11 = por %p1435_p10, %p1434_p9 }
 0x64e   : > { %p1437_p13 = pnand %p1436_p11, %p1430_p8 }
 0x650   : > { %1440 = shalt.err (!%p1437_p13)
}
 0x651   : > { %s1441_s28 = scalar_lea.hbm %s1813_s21, %s1803_s30  ;;  %s1445_s25 = scalar_lea.hbm %s1871_s10, 640 }
 0x652   : > { %p1442_p0 = scmp.ne.s32.totalorder %s1813_s21, %s1441_s28  ;;  %p1446_p3 = scmp.lt.u32.totalorder %s1813_s21, %s1871_s10 }
 0x653   : > { %p1447_p4 = scmp.lt.u32.totalorder %s1445_s25, %s1441_s28  ;;  %p1449_p7 = scmp.lt.u32.totalorder %s1441_s28, %s1813_s21 }
 0x654   : > { %p1443_p1 = pnand %p1442_p0, %p1208_p12 }
 0x655   : > { %p1448_p5 = por %p1447_p4, %p1446_p3 }
 0x656   : > { %p1444_p2 = pneg %p1443_p1 }
 0x657   : > { %p1450_p8 = por %p1449_p7, %p1448_p5 }
 0x659   : > { %p1451_p9 = pnand %p1450_p8, %p1444_p2 }
 0x65b   : > { %1454 = shalt.err (!%p1451_p9)
}
 0x65c   : > { %s1502_s23 = smov 128   ;;  %s1503_s12 = smov 8  }
 0x65d   : > { %s1882_s1 = scalar_lea.sflag [#allocation5], %s1697_s20 }
 0x65e   : > { %1054 = dma.vmem_to_hbm [thread:$0]  (%p1208_p12), %s1816_s29, %s1803_s30, %s1813_s21, %s1882_s1, %s1502_s23, %s1502_s23, %s1503_s12  }
 0x65f PF: > { %p1318_p10 = scmp.ge.s32.totalorder %s1493_s16, 2  ;;  %s1063_s22 = sand.u32 1, %s1481_s13  }
 0x660   : > { %s1064_s26 = scalar_lea.sflag [#allocation3], %s1063_s22 }
 0x661   : > { %p1312_p11 = pnand %p1318_p10, %p1601_p6 }
 0x663   : > { %1472 = dma.done.wait (!%p1312_p11), %s1064_s26, 256  }
 0x664   : > { %1474 = vsyncadd (!%p1312_p11), %s1064_s26, 4294967040  ;;  %s1073_s17 = scalar_lea.sflag [#allocation5], %s1063_s22 }
 0x665   : > { %1476 = dma.done.wait (!%p1312_p11), %s1073_s17, 256  }
 0x666   : > { %1478 = vsyncadd (!%p1312_p11), %s1073_s17, 4294967040  ;;  %s1883_s20 = sld [smem:[#allocation8_spill]]  ;;  %p24_p12 = scmp.ge.s32.totalorder %s1584_s19, 5  }
 0x667   : > { %s1884_s13 = smov %s1485_s14  ;;  %s1885_s14 = smov %s1489_s15 }
 0x668   : > { %s1887_s16 = smov %s1584_s19  ;;  %26 = sbr.rel (!%p24_p12) target bundleno = 8 (0x8), region = 111 }
 0x66c   : > { %s1886_s15 = smov %s1883_s20 }
 0x66f   :  { %1078 = vsyncpa [#allocation3], 1 }
 0x670   :  { %1080 = vsyncpa [#allocation3 + $0x1], 1 }
 0x671   :  { %1081 = vsyncpa [#allocation5], 1 }
 0x672   :  { %1083 = vsyncpa [#allocation5 + $0x1], 1 }

</bundles_post_ra>
